<compile_context>
chip_gen: v7x
topology: tpu7x:2x2x1
jax: 0.10.0
libtpu: 0.0.40
codegen_flags: <defaults>
</compile_context>

<pallas_src>
import jax
import jax.numpy as jnp
import numpy as np
from jax.experimental import pallas as pl
from jax.experimental.pallas import tpu as pltpu

# --- model hyper-parameters (small, consistent with the module) ---
DIM = 32
HEADS = 2
DIM_HEAD = 16
INNER = HEADS * DIM_HEAD          # == DIM so project_out's Linear is shape-valid
MLP_DIM = 64
SEQ = 8
BATCH = 2
EPS = 1e-5                        # nn.LayerNorm default eps
SCALE = DIM_HEAD ** (-0.5)
NEG_INF = -1e30                   # finite "minus infinity" (NaN-safe masking)

# contract last dim of both operands -> q @ k^T without materializing k.T
NT_DIMS = (((1,), (1,)), ((), ()))


def _layernorm(x, g, b):
    mu = jnp.mean(x, axis=-1, keepdims=True)
    var = jnp.mean((x - mu) ** 2, axis=-1, keepdims=True)
    return (x - mu) * jax.lax.rsqrt(var + EPS) * g + b


def block_kernel(x_ref, vecs_ref, wqkv_ref, w13_ref, wproj_ref, o_ref):
    M, D = x_ref.shape                      # M = BATCH * SEQ (batch-fused rows)

    # Block-diagonal causal mask for the batch-fused (M, M) score matrix:
    # row attends to col iff same batch AND col <= row.  Built with iota +
    # comparisons only (no vector div/mod), hoisted out of the head loop.
    row = jax.lax.broadcasted_iota(jnp.int32, (M, M), 0)
    col = jax.lax.broadcasted_iota(jnp.int32, (M, M), 1)
    causal = row >= col
    same_b = (row < SEQ) & (col < SEQ)
    for b0 in range(1, M // SEQ):           # static, tiny (BATCH-1 iterations)
        lo = b0 * SEQ
        hi = lo + SEQ
        same_b = same_b | ((row >= lo) & (row < hi) & (col >= lo) & (col < hi))
    mask = jnp.where(same_b & causal, 0.0, NEG_INF).astype(jnp.float32)

    g1, b1 = vecs_ref[0], vecs_ref[1]
    g2, b2 = vecs_ref[2], vecs_ref[3]
    to_b = vecs_ref[4]

    wqkv = wqkv_ref[...]                    # (D, 3*INNER), SCALE folded into q cols
    w13 = w13_ref[...]                      # (D, 2*MLP_DIM), lane-dense 128
    wof = wproj_ref[:INNER, :]              # (INNER, D)  folded  wo @ to_w
    w2 = wproj_ref[INNER:, :]               # (MLP_DIM, D)

    xall = x_ref[...]                       # (M, D)

    # ---------------- Attention (batch-fused) ----------------
    xn = _layernorm(xall, g1, b1)
    qkv = jnp.dot(xn, wqkv, preferred_element_type=jnp.float32)     # (M, 3*INNER)

    att = to_b                              # project_out bias, broadcasts to (M, D)
    for h in range(HEADS):                  # static head loop, no concat
        lo = h * DIM_HEAD
        hi = lo + DIM_HEAD
        qh = qkv[:, lo:hi]                  # (M, DH), already scaled
        kh = qkv[:, INNER + lo:INNER + hi]
        vh = qkv[:, 2 * INNER + lo:2 * INNER + hi]

        scores = jax.lax.dot_general(qh, kh, NT_DIMS,
                                     preferred_element_type=jnp.float32) + mask
        m = jnp.max(scores, axis=-1, keepdims=True)
        e = jnp.exp(scores - m)
        s = jnp.sum(e, axis=-1, keepdims=True)
        attn = e * pl.reciprocal(s, approx=True)        # EUP reciprocal
        ctx = jnp.dot(attn, vh, preferred_element_type=jnp.float32)         # (M, DH)
        # accumulate through the folded output projection slice for head h
        att = att + jnp.dot(ctx, wof[lo:hi, :], preferred_element_type=jnp.float32)

    x1 = xall + att                         # first residual

    # ---------------- FeedForward (SwiGLU, batch-fused) ----------------
    xn2 = _layernorm(x1, g2, b2)
    h13 = jnp.dot(xn2, w13, preferred_element_type=jnp.float32)     # (M, 128)
    h1 = h13[:, :MLP_DIM]
    h3 = h13[:, MLP_DIM:]
    ff = jnp.dot(h1 * jax.nn.sigmoid(h1) * h3, w2,
                 preferred_element_type=jnp.float32)                # (M, D)

    o_ref[...] = (x1 + ff).astype(o_ref.dtype)   # second residual, one store


def _full_spec(shape):
    nd = len(shape)
    return pl.BlockSpec(shape, lambda i, _nd=nd: (0,) * _nd)


def block_forward(x, params):
    B, N, D = x.shape

    # Host-side (trace-time) weight fusions / folds.
    wqkv = jnp.concatenate([params["wq"] * SCALE,           # SCALE folded into q
                            params["wk"], params["wv"]], axis=1)     # (D, 3*INNER)
    wof = params["wo"] @ params["to_w"]                              # (INNER, D)
    wproj = jnp.concatenate([wof, params["w2"]], axis=0)             # (INNER+MLP, D)
    w13 = jnp.concatenate([params["w1"], params["w3"]], axis=1)      # (D, 2*MLP)
    vecs = jnp.concatenate([params["ln1_g"], params["ln1_b"],
                            params["ln2_g"], params["ln2_b"],
                            params["to_b"],
                            jnp.zeros((3, D), jnp.float32)], axis=0)  # (8, D)

    x2d = x.reshape(B * N, D)               # batch fused into the row axis
    args = (x2d, vecs, wqkv, w13, wproj)

    out2d = pl.pallas_call(
        block_kernel,
        out_shape=jax.ShapeDtypeStruct((B * N, D), x.dtype),
        grid=(1,),
        in_specs=[_full_spec(a.shape) for a in args],
        out_specs=_full_spec((B * N, D)),
        compiler_params=pltpu.CompilerParams(
            dimension_semantics=("arbitrary",)),
    )(*args)
    return out2d.reshape(B, N, D)


# ---------------- pure-JAX reference (mirrors the PyTorch forward) ----------------
def reference_forward(x, p, mask):
    def ln(t, g, b):
        mu = jnp.mean(t, axis=-1, keepdims=True)
        var = jnp.mean((t - mu) ** 2, axis=-1, keepdims=True)
        return (t - mu) / jnp.sqrt(var + EPS) * g + b

    B, N, D = x.shape
    xn = ln(x, p["ln1_g"][0], p["ln1_b"][0])
    q = (xn @ p["wq"]).reshape(B, N, HEADS, DIM_HEAD).transpose(0, 2, 1, 3)
    k = (xn @ p["wk"]).reshape(B, N, HEADS, DIM_HEAD).transpose(0, 2, 1, 3)
    v = (xn @ p["wv"]).reshape(B, N, HEADS, DIM_HEAD).transpose(0, 2, 1, 3)
    scores = jnp.einsum("bhqd,bhkd->bhqk", q, k) * SCALE + mask[None, None]
    attn = jax.nn.softmax(scores, axis=-1)
    out = jnp.einsum("bhqk,bhkd->bhqd", attn, v)
    out = out.transpose(0, 2, 1, 3).reshape(B, N, INNER)
    out = out @ p["wo"]
    out = out @ p["to_w"] + p["to_b"][0]
    x1 = x + out

    xn2 = ln(x1, p["ln2_g"][0], p["ln2_b"][0])
    h1 = xn2 @ p["w1"]
    h1 = h1 * jax.nn.sigmoid(h1)
    ff = (h1 * (xn2 @ p["w3"])) @ p["w2"]
    return x1 + ff


def make_params(key):
    ks = jax.random.split(key, 10)
    s = 0.05
    return {
        "ln1_g": jnp.ones((1, DIM), jnp.float32),
        "ln1_b": jnp.zeros((1, DIM), jnp.float32),
        "wq": s * jax.random.normal(ks[0], (DIM, INNER), jnp.float32),
        "wk": s * jax.random.normal(ks[1], (DIM, INNER), jnp.float32),
        "wv": s * jax.random.normal(ks[2], (DIM, INNER), jnp.float32),
        "wo": s * jax.random.normal(ks[3], (INNER, DIM), jnp.float32),
        "to_w": s * jax.random.normal(ks[4], (INNER, DIM), jnp.float32),
        "to_b": s * jax.random.normal(ks[5], (1, DIM), jnp.float32),
        "ln2_g": jnp.ones((1, DIM), jnp.float32),
        "ln2_b": jnp.zeros((1, DIM), jnp.float32),
        "w1": s * jax.random.normal(ks[6], (DIM, MLP_DIM), jnp.float32),
        "w3": s * jax.random.normal(ks[7], (DIM, MLP_DIM), jnp.float32),
        "w2": s * jax.random.normal(ks[8], (MLP_DIM, DIM), jnp.float32),
    }


if __name__ == "__main__":
    key = jax.random.PRNGKey(0)
    kx, kp = jax.random.split(key)
    x = jax.random.normal(kx, (BATCH, SEQ, DIM), jnp.float32)
    params = make_params(kp)

    out = jax.block_until_ready(block_forward(x, params))

    # causal mask for the reference, same as torch.triu(full(-inf), diagonal=1)
    mask = jnp.triu(jnp.full((SEQ, SEQ), -jnp.inf, jnp.float32), k=1)
    ref = reference_forward(x, params, mask)

    # tolerance 1e-3: approx=True softmax reciprocal (EUP) perturbs the
    # normalization slightly; effect on the residual-stream output is ~1e-4.
    np.testing.assert_allclose(np.asarray(out), np.asarray(ref), rtol=1e-3, atol=1e-3)
    print("KERNEL_OK")
</pallas_src>

<mosaic_0001>
module attributes {stable_mosaic.version = 11 : i64} {
  func.func @block_kernel(%arg0: i32, %arg1: memref<16x32xf32, #tpu.memory_space<vmem>>, %arg2: memref<8x32xf32, #tpu.memory_space<vmem>>, %arg3: memref<32x96xf32, #tpu.memory_space<vmem>>, %arg4: memref<32x128xf32, #tpu.memory_space<vmem>>, %arg5: memref<96x32xf32, #tpu.memory_space<vmem>>, %arg6: memref<16x32xf32, #tpu.memory_space<vmem>>) attributes {dimension_semantics = [#tpu.dimension_semantics<arbitrary>], iteration_bounds = array<i64: 1>, scalar_prefetch = 0 : i64, scratch_operands = 0 : i64, tpu.core_type = #tpu.core_type<tc>, window_params = [{pipeline_mode = #tpu.pipeline_mode<synchronous>, transform_indices = @transform_0, window_bounds = array<i64: 16, 32>}, {pipeline_mode = #tpu.pipeline_mode<synchronous>, transform_indices = @transform_1, window_bounds = array<i64: 8, 32>}, {pipeline_mode = #tpu.pipeline_mode<synchronous>, transform_indices = @transform_2, window_bounds = array<i64: 32, 96>}, {pipeline_mode = #tpu.pipeline_mode<synchronous>, transform_indices = @transform_3, window_bounds = array<i64: 32, 128>}, {pipeline_mode = #tpu.pipeline_mode<synchronous>, transform_indices = @transform_4, window_bounds = array<i64: 96, 32>}, {pipeline_mode = #tpu.pipeline_mode<synchronous>, transform_indices = @transform_5, window_bounds = array<i64: 16, 32>}]} {
    %0 = tpu.iota {dimensions = array<i32: 0>} : vector<16x16xi32>
    %1 = tpu.iota {dimensions = array<i32: 1>} : vector<16x16xi32>
    %2 = arith.cmpi sge, %0, %1 : vector<16x16xi32>
    %c8_i32 = arith.constant 8 : i32
    %3 = vector.broadcast %c8_i32 : i32 to vector<16x16xi32>
    %4 = arith.cmpi slt, %0, %3 : vector<16x16xi32>
    %c8_i32_0 = arith.constant 8 : i32
    %5 = vector.broadcast %c8_i32_0 : i32 to vector<16x16xi32>
    %6 = arith.cmpi slt, %1, %5 : vector<16x16xi32>
    %7 = arith.andi %4, %6 : vector<16x16xi1>
    %c8_i32_1 = arith.constant 8 : i32
    %8 = vector.broadcast %c8_i32_1 : i32 to vector<16x16xi32>
    %9 = arith.cmpi sge, %0, %8 : vector<16x16xi32>
    %c16_i32 = arith.constant 16 : i32
    %10 = vector.broadcast %c16_i32 : i32 to vector<16x16xi32>
    %11 = arith.cmpi slt, %0, %10 : vector<16x16xi32>
    %12 = arith.andi %9, %11 : vector<16x16xi1>
    %c8_i32_2 = arith.constant 8 : i32
    %13 = vector.broadcast %c8_i32_2 : i32 to vector<16x16xi32>
    %14 = arith.cmpi sge, %1, %13 : vector<16x16xi32>
    %15 = arith.andi %12, %14 : vector<16x16xi1>
    %c16_i32_3 = arith.constant 16 : i32
    %16 = vector.broadcast %c16_i32_3 : i32 to vector<16x16xi32>
    %17 = arith.cmpi slt, %1, %16 : vector<16x16xi32>
    %18 = arith.andi %15, %17 : vector<16x16xi1>
    %19 = arith.ori %7, %18 : vector<16x16xi1>
    %20 = arith.andi %19, %2 : vector<16x16xi1>
    %cst = arith.constant 0.000000e+00 : f32
    %cst_4 = arith.constant -1.000000e+30 : f32
    %21 = vector.broadcast %cst : f32 to vector<16x16xf32>
    %22 = vector.broadcast %cst_4 : f32 to vector<16x16xf32>
    %23 = arith.select %20, %21, %22 : vector<16x16xi1>, vector<16x16xf32>
    %c0 = arith.constant 0 : index
    %c0_5 = arith.constant 0 : index
    %24 = vector.load %arg2[%c0, %c0_5] : memref<8x32xf32, #tpu.memory_space<vmem>>, vector<1x32xf32>
    %25 = vector.shape_cast %24 : vector<1x32xf32> to vector<32xf32>
    %c1 = arith.constant 1 : index
    %c0_6 = arith.constant 0 : index
    %26 = vector.load %arg2[%c1, %c0_6] : memref<8x32xf32, #tpu.memory_space<vmem>>, vector<1x32xf32>
    %27 = vector.shape_cast %26 : vector<1x32xf32> to vector<32xf32>
    %c2 = arith.constant 2 : index
    %c0_7 = arith.constant 0 : index
    %28 = vector.load %arg2[%c2, %c0_7] : memref<8x32xf32, #tpu.memory_space<vmem>>, vector<1x32xf32>
    %29 = vector.shape_cast %28 : vector<1x32xf32> to vector<32xf32>
    %c3 = arith.constant 3 : index
    %c0_8 = arith.constant 0 : index
    %30 = vector.load %arg2[%c3, %c0_8] : memref<8x32xf32, #tpu.memory_space<vmem>>, vector<1x32xf32>
    %31 = vector.shape_cast %30 : vector<1x32xf32> to vector<32xf32>
    %c4 = arith.constant 4 : index
    %c0_9 = arith.constant 0 : index
    %32 = vector.load %arg2[%c4, %c0_9] : memref<8x32xf32, #tpu.memory_space<vmem>>, vector<1x32xf32>
    %33 = vector.shape_cast %32 : vector<1x32xf32> to vector<32xf32>
    %c0_10 = arith.constant 0 : index
    %c0_11 = arith.constant 0 : index
    %34 = vector.load %arg3[%c0_10, %c0_11] : memref<32x96xf32, #tpu.memory_space<vmem>>, vector<32x96xf32>
    %c0_12 = arith.constant 0 : index
    %c0_13 = arith.constant 0 : index
    %35 = vector.load %arg4[%c0_12, %c0_13] : memref<32x128xf32, #tpu.memory_space<vmem>>, vector<32x128xf32>
    %c0_14 = arith.constant 0 : index
    %c0_15 = arith.constant 0 : index
    %36 = vector.load %arg5[%c0_14, %c0_15] : memref<96x32xf32, #tpu.memory_space<vmem>>, vector<32x32xf32>
    %c32 = arith.constant 32 : index
    %c0_16 = arith.constant 0 : index
    %37 = vector.load %arg5[%c32, %c0_16] : memref<96x32xf32, #tpu.memory_space<vmem>>, vector<64x32xf32>
    %c0_17 = arith.constant 0 : index
    %c0_18 = arith.constant 0 : index
    %38 = vector.load %arg1[%c0_17, %c0_18] : memref<16x32xf32, #tpu.memory_space<vmem>>, vector<16x32xf32>
    %cst_19 = arith.constant dense<0.000000e+00> : vector<16xf32>
    %39 = vector.multi_reduction <add>, %38, %cst_19 [1] : vector<16x32xf32> to vector<16xf32>
    %40 = vector.shape_cast %39 : vector<16xf32> to vector<16x1xf32>
    %cst_20 = arith.constant 3.200000e+01 : f32
    %41 = vector.broadcast %cst_20 : f32 to vector<16x1xf32>
    %42 = arith.divf %40, %41 : vector<16x1xf32>
    %43 = vector.broadcast %42 : vector<16x1xf32> to vector<16x32xf32>
    %44 = arith.subf %38, %43 : vector<16x32xf32>
    %45 = arith.mulf %44, %44 : vector<16x32xf32>
    %cst_21 = arith.constant dense<0.000000e+00> : vector<16xf32>
    %46 = vector.multi_reduction <add>, %45, %cst_21 [1] : vector<16x32xf32> to vector<16xf32>
    %47 = vector.shape_cast %46 : vector<16xf32> to vector<16x1xf32>
    %cst_22 = arith.constant 3.200000e+01 : f32
    %48 = vector.broadcast %cst_22 : f32 to vector<16x1xf32>
    %49 = arith.divf %47, %48 : vector<16x1xf32>
    %50 = vector.broadcast %42 : vector<16x1xf32> to vector<16x32xf32>
    %51 = arith.subf %38, %50 : vector<16x32xf32>
    %cst_23 = arith.constant 9.99999974E-6 : f32
    %52 = vector.broadcast %cst_23 : f32 to vector<16x1xf32>
    %53 = arith.addf %49, %52 : vector<16x1xf32>
    %54 = math.rsqrt %53 : vector<16x1xf32>
    %55 = vector.broadcast %54 : vector<16x1xf32> to vector<16x32xf32>
    %56 = arith.mulf %51, %55 : vector<16x32xf32>
    %57 = vector.shape_cast %25 : vector<32xf32> to vector<1x32xf32>
    %58 = vector.broadcast %57 : vector<1x32xf32> to vector<16x32xf32>
    %59 = arith.mulf %56, %58 : vector<16x32xf32>
    %60 = vector.shape_cast %27 : vector<32xf32> to vector<1x32xf32>
    %61 = vector.broadcast %60 : vector<1x32xf32> to vector<16x32xf32>
    %62 = arith.addf %59, %61 : vector<16x32xf32>
    %cst_24 = arith.constant dense<0.000000e+00> : vector<16x96xf32>
    %63 = tpu.matmul %62, %34, %cst_24 {dimension_numbers = #tpu.dot_dimension_numbers<[1], [0], [0], [1], [0, 0, 1, 1], [], []>} : vector<16x32xf32>, vector<32x96xf32>, vector<16x96xf32> -> vector<16x96xf32>
    %64 = vector.extract_strided_slice %63 {offsets = [0, 0], sizes = [16, 16], strides = [1, 1]} : vector<16x96xf32> to vector<16x16xf32>
    %65 = vector.extract_strided_slice %63 {offsets = [0, 32], sizes = [16, 16], strides = [1, 1]} : vector<16x96xf32> to vector<16x16xf32>
    %66 = vector.extract_strided_slice %63 {offsets = [0, 64], sizes = [16, 16], strides = [1, 1]} : vector<16x96xf32> to vector<16x16xf32>
    %cst_25 = arith.constant dense<0.000000e+00> : vector<16x16xf32>
    %67 = tpu.matmul %64, %65, %cst_25 {dimension_numbers = #tpu.dot_dimension_numbers<[1], [1], [0], [0], [0, 0, 1, 0], [], []>} : vector<16x16xf32>, vector<16x16xf32>, vector<16x16xf32> -> vector<16x16xf32>
    %68 = arith.addf %67, %23 : vector<16x16xf32>
    %cst_26 = arith.constant dense<0xFF800000> : vector<16xf32>
    %69 = vector.multi_reduction <maximumf>, %68, %cst_26 [1] : vector<16x16xf32> to vector<16xf32>
    %70 = vector.shape_cast %69 : vector<16xf32> to vector<16x1xf32>
    %71 = vector.broadcast %70 : vector<16x1xf32> to vector<16x16xf32>
    %72 = arith.subf %68, %71 : vector<16x16xf32>
    %73 = math.exp %72 : vector<16x16xf32>
    %cst_27 = arith.constant dense<0.000000e+00> : vector<16xf32>
    %74 = vector.multi_reduction <add>, %73, %cst_27 [1] : vector<16x16xf32> to vector<16xf32>
    %75 = vector.shape_cast %74 : vector<16xf32> to vector<16x1xf32>
    %76 = tpu.reciprocal %75 {approx = true} : vector<16x1xf32> -> vector<16x1xf32>
    %77 = vector.broadcast %76 : vector<16x1xf32> to vector<16x16xf32>
    %78 = arith.mulf %73, %77 : vector<16x16xf32>
    %cst_28 = arith.constant dense<0.000000e+00> : vector<16x16xf32>
    %79 = tpu.matmul %78, %66, %cst_28 {dimension_numbers = #tpu.dot_dimension_numbers<[1], [0], [0], [1], [0, 0, 1, 1], [], []>} : vector<16x16xf32>, vector<16x16xf32>, vector<16x16xf32> -> vector<16x16xf32>
    %80 = vector.extract_strided_slice %36 {offsets = [0, 0], sizes = [16, 32], strides = [1, 1]} : vector<32x32xf32> to vector<16x32xf32>
    %cst_29 = arith.constant dense<0.000000e+00> : vector<16x32xf32>
    %81 = tpu.matmul %79, %80, %cst_29 {dimension_numbers = #tpu.dot_dimension_numbers<[1], [0], [0], [1], [0, 0, 1, 1], [], []>} : vector<16x16xf32>, vector<16x32xf32>, vector<16x32xf32> -> vector<16x32xf32>
    %82 = vector.shape_cast %33 : vector<32xf32> to vector<1x32xf32>
    %83 = vector.broadcast %82 : vector<1x32xf32> to vector<16x32xf32>
    %84 = arith.addf %83, %81 : vector<16x32xf32>
    %85 = vector.extract_strided_slice %63 {offsets = [0, 16], sizes = [16, 16], strides = [1, 1]} : vector<16x96xf32> to vector<16x16xf32>
    %86 = vector.extract_strided_slice %63 {offsets = [0, 48], sizes = [16, 16], strides = [1, 1]} : vector<16x96xf32> to vector<16x16xf32>
    %87 = vector.extract_strided_slice %63 {offsets = [0, 80], sizes = [16, 16], strides = [1, 1]} : vector<16x96xf32> to vector<16x16xf32>
    %cst_30 = arith.constant dense<0.000000e+00> : vector<16x16xf32>
    %88 = tpu.matmul %85, %86, %cst_30 {dimension_numbers = #tpu.dot_dimension_numbers<[1], [1], [0], [0], [0, 0, 1, 0], [], []>} : vector<16x16xf32>, vector<16x16xf32>, vector<16x16xf32> -> vector<16x16xf32>
    %89 = arith.addf %88, %23 : vector<16x16xf32>
    %cst_31 = arith.constant dense<0xFF800000> : vector<16xf32>
    %90 = vector.multi_reduction <maximumf>, %89, %cst_31 [1] : vector<16x16xf32> to vector<16xf32>
    %91 = vector.shape_cast %90 : vector<16xf32> to vector<16x1xf32>
    %92 = vector.broadcast %91 : vector<16x1xf32> to vector<16x16xf32>
    %93 = arith.subf %89, %92 : vector<16x16xf32>
    %94 = math.exp %93 : vector<16x16xf32>
    %cst_32 = arith.constant dense<0.000000e+00> : vector<16xf32>
    %95 = vector.multi_reduction <add>, %94, %cst_32 [1] : vector<16x16xf32> to vector<16xf32>
    %96 = vector.shape_cast %95 : vector<16xf32> to vector<16x1xf32>
    %97 = tpu.reciprocal %96 {approx = true} : vector<16x1xf32> -> vector<16x1xf32>
    %98 = vector.broadcast %97 : vector<16x1xf32> to vector<16x16xf32>
    %99 = arith.mulf %94, %98 : vector<16x16xf32>
    %cst_33 = arith.constant dense<0.000000e+00> : vector<16x16xf32>
    %100 = tpu.matmul %99, %87, %cst_33 {dimension_numbers = #tpu.dot_dimension_numbers<[1], [0], [0], [1], [0, 0, 1, 1], [], []>} : vector<16x16xf32>, vector<16x16xf32>, vector<16x16xf32> -> vector<16x16xf32>
    %101 = vector.extract_strided_slice %36 {offsets = [16, 0], sizes = [16, 32], strides = [1, 1]} : vector<32x32xf32> to vector<16x32xf32>
    %cst_34 = arith.constant dense<0.000000e+00> : vector<16x32xf32>
    %102 = tpu.matmul %100, %101, %cst_34 {dimension_numbers = #tpu.dot_dimension_numbers<[1], [0], [0], [1], [0, 0, 1, 1], [], []>} : vector<16x16xf32>, vector<16x32xf32>, vector<16x32xf32> -> vector<16x32xf32>
    %103 = arith.addf %84, %102 : vector<16x32xf32>
    %104 = arith.addf %38, %103 : vector<16x32xf32>
    %cst_35 = arith.constant dense<0.000000e+00> : vector<16xf32>
    %105 = vector.multi_reduction <add>, %104, %cst_35 [1] : vector<16x32xf32> to vector<16xf32>
    %106 = vector.shape_cast %105 : vector<16xf32> to vector<16x1xf32>
    %cst_36 = arith.constant 3.200000e+01 : f32
    %107 = vector.broadcast %cst_36 : f32 to vector<16x1xf32>
    %108 = arith.divf %106, %107 : vector<16x1xf32>
    %109 = vector.broadcast %108 : vector<16x1xf32> to vector<16x32xf32>
    %110 = arith.subf %104, %109 : vector<16x32xf32>
    %111 = arith.mulf %110, %110 : vector<16x32xf32>
    %cst_37 = arith.constant dense<0.000000e+00> : vector<16xf32>
    %112 = vector.multi_reduction <add>, %111, %cst_37 [1] : vector<16x32xf32> to vector<16xf32>
    %113 = vector.shape_cast %112 : vector<16xf32> to vector<16x1xf32>
    %cst_38 = arith.constant 3.200000e+01 : f32
    %114 = vector.broadcast %cst_38 : f32 to vector<16x1xf32>
    %115 = arith.divf %113, %114 : vector<16x1xf32>
    %116 = vector.broadcast %108 : vector<16x1xf32> to vector<16x32xf32>
    %117 = arith.subf %104, %116 : vector<16x32xf32>
    %cst_39 = arith.constant 9.99999974E-6 : f32
    %118 = vector.broadcast %cst_39 : f32 to vector<16x1xf32>
    %119 = arith.addf %115, %118 : vector<16x1xf32>
    %120 = math.rsqrt %119 : vector<16x1xf32>
    %121 = vector.broadcast %120 : vector<16x1xf32> to vector<16x32xf32>
    %122 = arith.mulf %117, %121 : vector<16x32xf32>
    %123 = vector.shape_cast %29 : vector<32xf32> to vector<1x32xf32>
    %124 = vector.broadcast %123 : vector<1x32xf32> to vector<16x32xf32>
    %125 = arith.mulf %122, %124 : vector<16x32xf32>
    %126 = vector.shape_cast %31 : vector<32xf32> to vector<1x32xf32>
    %127 = vector.broadcast %126 : vector<1x32xf32> to vector<16x32xf32>
    %128 = arith.addf %125, %127 : vector<16x32xf32>
    %cst_40 = arith.constant dense<0.000000e+00> : vector<16x128xf32>
    %129 = tpu.matmul %128, %35, %cst_40 {dimension_numbers = #tpu.dot_dimension_numbers<[1], [0], [0], [1], [0, 0, 1, 1], [], []>} : vector<16x32xf32>, vector<32x128xf32>, vector<16x128xf32> -> vector<16x128xf32>
    %130 = vector.extract_strided_slice %129 {offsets = [0, 0], sizes = [16, 64], strides = [1, 1]} : vector<16x128xf32> to vector<16x64xf32>
    %131 = vector.extract_strided_slice %129 {offsets = [0, 64], sizes = [16, 64], strides = [1, 1]} : vector<16x128xf32> to vector<16x64xf32>
    %132 = arith.negf %130 : vector<16x64xf32>
    %133 = math.exp %132 : vector<16x64xf32>
    %cst_41 = arith.constant 1.000000e+00 : f32
    %134 = vector.broadcast %cst_41 : f32 to vector<16x64xf32>
    %135 = arith.addf %134, %133 : vector<16x64xf32>
    %136 = arith.divf %134, %135 : vector<16x64xf32>
    %137 = arith.mulf %130, %136 : vector<16x64xf32>
    %138 = arith.mulf %137, %131 : vector<16x64xf32>
    %cst_42 = arith.constant dense<0.000000e+00> : vector<16x32xf32>
    %139 = tpu.matmul %138, %37, %cst_42 {dimension_numbers = #tpu.dot_dimension_numbers<[1], [0], [0], [1], [0, 0, 1, 1], [], []>} : vector<16x64xf32>, vector<64x32xf32>, vector<16x32xf32> -> vector<16x32xf32>
    %140 = arith.addf %104, %139 : vector<16x32xf32>
    %c0_43 = arith.constant 0 : index
    %c0_44 = arith.constant 0 : index
    %141 = vector.load %arg6[%c0_43, %c0_44] : memref<16x32xf32, #tpu.memory_space<vmem>>, vector<16x32xf32>
    tpu.vector_store %arg6[%c0_43, %c0_44], %140 {strides = array<i32>} : memref<16x32xf32, #tpu.memory_space<vmem>>, vector<16x32xf32>,
    return
  }
  func.func @transform_0(%arg0: i32) -> (i32, i32) {
    %c0_i32 = arith.constant 0 : i32
    %c0_i32_0 = arith.constant 0 : i32
    %c0_i32_1 = arith.constant 0 : i32
    return %c0_i32, %c0_i32_0 : i32, i32
  }
  func.func @transform_1(%arg0: i32) -> (i32, i32) {
    %c0_i32 = arith.constant 0 : i32
    %c0_i32_0 = arith.constant 0 : i32
    %c0_i32_1 = arith.constant 0 : i32
    return %c0_i32, %c0_i32_0 : i32, i32
  }
  func.func @transform_2(%arg0: i32) -> (i32, i32) {
    %c0_i32 = arith.constant 0 : i32
    %c0_i32_0 = arith.constant 0 : i32
    %c0_i32_1 = arith.constant 0 : i32
    return %c0_i32, %c0_i32_0 : i32, i32
  }
  func.func @transform_3(%arg0: i32) -> (i32, i32) {
    %c0_i32 = arith.constant 0 : i32
    %c0_i32_0 = arith.constant 0 : i32
    %c0_i32_1 = arith.constant 0 : i32
    return %c0_i32, %c0_i32_0 : i32, i32
  }
  func.func @transform_4(%arg0: i32) -> (i32, i32) {
    %c0_i32 = arith.constant 0 : i32
    %c0_i32_0 = arith.constant 0 : i32
    %c0_i32_1 = arith.constant 0 : i32
    return %c0_i32, %c0_i32_0 : i32, i32
  }
  func.func @transform_5(%arg0: i32) -> (i32, i32) {
    %c0_i32 = arith.constant 0 : i32
    %c0_i32_0 = arith.constant 0 : i32
    %c0_i32_1 = arith.constant 0 : i32
    return %c0_i32, %c0_i32_0 : i32, i32
  }
}

</mosaic_0001>

<bundles_post_ra>
// kernel: tpu_custom_call.1
= control target key start
LH: loop header
LB: loop body
LE: loop exit
PB: predicated region body
PF: predicated region fallthrough
CT: control target
= control target key end

     0   :  { %vm78_vm0 = vcmask 261120   ;;  %s1535_s0 = inlined_call_operand.vmem [shape: f32[16,32], index: 0, kind: input, shape index: {}]   ;;  %s1536_s1 = inlined_call_operand.vmem [shape: f32[8,32], index: 1, kind: input, shape index: {}]   ;;  %s1537_s2 = inlined_call_operand.vmem [shape: f32[32,96], index: 2, kind: input, shape index: {}]   ;;  %s1538_s3 = inlined_call_operand.vmem [shape: f32[32,128], index: 3, kind: input, shape index: {}]   ;;  %s1539_s4 = inlined_call_operand.vmem [shape: f32[96,32], index: 4, kind: input, shape index: {}]   ;;  %s1540_s5 = inlined_call_operand.hbm [shape: f32[16,32], index: 5, kind: output, shape index: {}]  }
   0x1   :  { %v1364_v0 = vld [vmem:[%s1535_s0] sm:$0xff]  ;;  %v1369_v1 = vld [vmem:[%s1535_s0 + $0x8] sm:$0xff] }
   0x2   :  { %10 = vsyncpa [#allocation3], 0  ;;  %v79_v2 = vsel %vm78_vm0, %v1364_v0, 0.0  ;;  %v82_v3 = vsel %vm78_vm0, %v1369_v1, 0.0  ;;  %v56_v14 = vld [vmem:[%s1537_s2] sm:$0xff]  ;;  %v57_v15 = vld [vmem:[%s1537_s2 + $0x8] sm:$0xff]  ;;  %v21_v44 = vlaneseq }
   0x3   :  { %80 = vadd.xlane.f32.xlu0 %v79_v2  ;;  %v58_v16 = vld [vmem:[%s1537_s2 + $0x10] sm:$0xff]  ;;  %v1173_v17 = vpack.c.bf16 %v57_v15, %v56_v14  ;;  %v59_v18 = vld [vmem:[%s1537_s2 + $0x18] sm:$0xff]  ;;  %v1015_v27 = vld [vmem:[%s1536_s1] ss:$0 sm:$0xff]  ;;  %vm205_vm1 = vcmask 130048   ;;  %s1322_s7 = smov 96  }
   0x4   :  { %v1177_v19 = vpack.c.bf16 %v59_v18, %v58_v16  ;;  %v1016_v29 = vld [vmem:[%s1536_s1 + $0x1] ss:$0 sm:$0xff]  ;;  %s1323_s8 = smov 80   ;;  %s1324_s9 = smov 112   ;;  %vm1406_vm2 = vmpackc.low %vm205_vm1, %vm205_vm1  ;;  %v22_v45 = vshrl.u32 %v21_v44, 7  ;;  %v25_v46 = vand.u32 127, %v21_v44 }
   0x5   :  { %1174 = vmatprep.subr.bf16.mxu0 %v1173_v17  ;;  %v1325_v48 = vmov -1e+30   ;;  %s1326_s10 = smov 64   ;;  %s1327_s15 = smov 48   ;;  %vm913_vm11 = vcmask 523264  }
   0x6   :  { %1176 = vmatpush3.bf16.msra.mxu0 %v1173_v17  ;;  %v23_v47 = vadd.s32 8, %v22_v45  ;;  %vm39_vm3 = vcmp.ge.s32.totalorder %v25_v46, 8  ;;  %vm42_vm4 = vcmp.lt.s32.totalorder %v25_v46, 16  ;;  %vm26_vm5 = vcmp.ge.s32.totalorder %v22_v45, %v25_v46 }
   0x7   :  { %83 = vadd.xlane.f32.xlu0 %v82_v3  ;;  %1178 = vmatprep.subr.bf16.mxu0 %v1177_v19  ;;  %vm30_vm6 = vcmp.lt.s32.totalorder %v25_v46, 8  ;;  %vm44_vm8 = vmand %vm39_vm3, %vm42_vm4 }
   0x8   :  { %vm27_vm7 = vcmp.ge.s32.totalorder %v23_v47, %v25_v46  ;;  %vm47_vm9 = vmand %vm30_vm6, %vm26_vm5 }
   0x9   :  { %vm48_vm10 = vmand %vm44_vm8, %vm27_vm7  ;;  %v1415_v49 = vsel %vm47_vm9, 0.0, %v1325_v48 }
   0xa   :  { %1180 = vmatpush3.bf16.msra.mxu0 %v1177_v19  ;;  %v50_v51 = vsel %vm48_vm10, 0.0, %v1325_v48  ;;  %v66_v48 = vld [vmem:[%s1539_s4 + $0x10] sm:$0xff] }
  0x90   :  { %v81_v4 = vpop.xlane.xlu0 %80 }
  0x91   :  { %v86_v5 = vmul.f32 0.03125, %v81_v4 }
  0x93   :  { %v88_v6 = vsub.f32 %v1364_v0, %v86_v5 }
  0x94   :  { %v84_v7 = vpop.xlane.xlu0 %83 }
  0x95   :  { %v87_v8 = vmul.f32 0.03125, %v84_v7  ;;  %v90_v9 = vmul.f32 %v88_v6, %v88_v6 }
  0x97   :  { %v89_v10 = vsub.f32 %v1369_v1, %v87_v8  ;;  %v92_v11 = vsel %vm78_vm0, %v90_v9, 0.0  ;;  %v64_v8 = vld [vmem:[%s1539_s4] sm:$0xff]  ;;  %v65_v9 = vld [vmem:[%s1539_s4 + $0x8] sm:$0xff] }
  0x98   :  { %93 = vadd.xlane.f32.xlu1 %v92_v11 }
  0x99   :  { %v91_v12 = vmul.f32 %v89_v10, %v89_v10 }
  0x9b   :  { %v95_v13 = vsel %vm78_vm0, %v91_v12, 0.0 }
  0x9c   :  { %96 = vadd.xlane.f32.xlu1 %v95_v13  ;;  %v1191_v13 = vpack.c.bf16 %v65_v9, %v64_v8 }
 0x125   :  { %v94_v20 = vpop.xlane.xlu1 %93 }
 0x126   :  { %v98_v21 = vmul.f32 0.03125, %v94_v20 }
 0x128   :  { %v100_v22 = vadd.f32 1e-05, %v98_v21 }
 0x129   :  { %v97_v23 = vpop.xlane.xlu1 %96 }
 0x12a   :  { %1266 = vrsqrt.f32 %v100_v22  ;;  %v99_v24 = vmul.f32 0.03125, %v97_v23 }
 0x12c   :  { %v101_v25 = vadd.f32 1e-05, %v99_v24 }
 0x12e   :  { %1268 = vrsqrt.f32 %v101_v25 }
 0x134   :  { %v1267_v26 = vpop.eup %1266 }
 0x135   :  { %v104_v28 = vmul.f32 %v1267_v26, %v88_v6 }
 0x137   :  { %v110_v30 = vmul.f32 %v1015_v27, %v104_v28 }
 0x138   :  { %v1269_v31 = vpop.eup %1268 }
 0x139   :  { %v105_v32 = vmul.f32 %v1269_v31, %v89_v10  ;;  %v116_v33 = vadd.f32 %v1016_v29, %v110_v30 }
 0x13b   :  { %v111_v34 = vmul.f32 %v1015_v27, %v105_v32  ;;  %1098 = vmatprep.mubr.msk.f32.mxu0 %vm78_vm0, %v116_v33 }
 0x13d   :  { %v117_v35 = vadd.f32 %v1016_v29, %v111_v34 }
 0x13f   :  { %1099 = vmatmul.mubr.msk.f32.vlgmr.msra.gmra.mrb[0].mxu0 %vm78_vm0, %v117_v35 }
 0x212   :  { %v1100_v36 = vpop.f32.mrb[0].mxu0 }
 0x213   :  { %v190_v37 = vpop.f32.mrb[1].mxu0 }
 0x214   :  { %1105 = vmatprep.mubr.msk.f32.mxu1 %vm205_vm1, %v190_v37  ;;  %v1400_v38 = vpack.i.bf16 %v1100_v36, %v190_v37 }
 0x216   :  { %1247 = vrot.lane.b32.xlu0 %v1400_v38, %s1322_s7 }
 0x21a   :  { %1257 = vrot.lane.b32.xlu0 %v1400_v38, %s1323_s8 }
 0x21e   :  { %485 = vrot.lane.b32.xlu0 %v190_v37, %s1324_s9 }
 0x222   :  { %487 = vrot.lane.b32.xlu0 %v1100_v36, %s1324_s9 }
 0x288   :  { %v1248_v39 = vpop.permute.xlu0 %1247 }
 0x289   :  { %v1250_v40 = vunpack.i.h.bf16 %v1248_v39  ;;  %v1249_v41 = vunpack.i.l.bf16 %v1248_v39 }
 0x28b   :  { %v1181_v43 = vpack.c.bf16 %v1250_v40, %v1249_v41 }
 0x28c   :  { %v1258_v14 = vpop.permute.xlu0 %1257 }
 0x28d   :  { %1183 = vmatprep.subr.msk.bf16.mxu1 %vm1406_vm2, %v1181_v43  ;;  %v1260_v17 = vunpack.i.h.bf16 %v1258_v14  ;;  %v1259_v18 = vunpack.i.l.bf16 %v1258_v14 }
 0x28e   :  { %1186 = vmatpush3.bf16.xpose.msk.msra.mxu1 %vm1406_vm2, %v1181_v43 }
 0x28f   :  { %v1195_v21 = vpack.c.bf16 %v1260_v17, %v1259_v18  ;;  %v61_v17 = vld [vmem:[%s1538_s3 + $0x8] sm:$0xff] }
 0x290   :  { %v486_v24 = vpop.permute.xlu0 %485 }
 0x294   :  { %v488_v25 = vpop.permute.xlu0 %487 }
 0x295   :  { %1106 = vmatmul.mubr.msk.f32.vlgmr.msra.gmra.mrb[0].mxu1 %vm205_vm1, %v1100_v36 }
 0x368   :  { %v1107_v50 = vpop.f32.mrb[0].mxu1 }
 0x369   :  { %v280_v52 = vpop.f32.mrb[1].mxu1  ;;  %v286_v54 = vadd.f32 %v1107_v50, %v50_v51 }
 0x36a   :  { %v281_v53 = vadd.f32 %v280_v52, %v1415_v49 }
 0x36b   :  { %v292_v56 = vsel %vm205_vm1, %v286_v54, -inf }
 0x36c   :  { %v289_v55 = vsel %vm205_vm1, %v281_v53, -inf }
 0x36d   :  { %290 = vmax.xlane.f32.xlu1 %v289_v55 }
 0x371   :  { %293 = vmax.xlane.f32.xlu1 %v292_v56 }
 0x3fa   :  { %v291_v57 = vpop.xlane.xlu1 %290 }
 0x3fb   :  { %v295_v58 = vsub.f32 %v281_v53, %v291_v57 }
 0x3fd   :  { %v297_v61 = vmul.f32 1.442695, %v295_v58 }
 0x3fe   :  { %v294_v59 = vpop.xlane.xlu1 %293 }
 0x3ff   :  { %v296_v60 = vsub.f32 %v286_v54, %v294_v59  ;;  %v1027_v59 = vld [vmem:[%s1536_s1 + $0x4] ss:$0 sm:$0xff] }
 0x401   :  { %v299_v62 = vmul.f32 1.442695, %v296_v60 }
 0x403   :  { %1270 = vpow2.f32 %v299_v62 }
 0x404   :  { %1272 = vpow2.f32 %v297_v61 }
 0x40d   :  { %v1271_v63 = vpop.eup %1270 }
 0x40e   :  { %v304_v2 = vsel %vm205_vm1, %v1271_v63, 0.0  ;;  %v1273_v3 = vpop.eup %1272 }
 0x40f   :  { %305 = vadd.xlane.f32.xlu1 %v304_v2  ;;  %v301_v4 = vsel %vm205_vm1, %v1273_v3, 0.0 }
 0x413   :  { %302 = vadd.xlane.f32.xlu1 %v301_v4 }
 0x424   :  { %1252 = vrot.lane.b32.xlu1 %v1400_v38, %s1326_s10 }
 0x49c   :  { %v306_v5 = vpop.xlane.xlu1 %305 }
 0x49d   :  { %1274 = vrcp.f32 %v306_v5 }
 0x4a0   :  { %v303_v6 = vpop.xlane.xlu1 %302 }
 0x4a1   :  { %1276 = vrcp.f32 %v303_v6 }
 0x4a4   :  { %v1253_v7 = vpop.permute.xlu1 %1252 }
 0x4a5   :  { %v1255_v10 = vunpack.i.h.bf16 %v1253_v7  ;;  %v1254_v11 = vunpack.i.l.bf16 %v1253_v7 }
 0x4a7   :  { %v1187_v12 = vpack.c.bf16 %v1255_v10, %v1254_v11  ;;  %v1275_v15 = vpop.eup %1274 }
 0x4a8   :  { %v310_v20 = vmul.f32 %v1275_v15, %v1271_v63 }
 0x4a9   :  { %1188 = vmatprep.subr.bf16.mxu0 %v1187_v12 }
 0x4aa   :  { %1190 = vmatpush3.bf16.msra.mxu0 %v1187_v12 }
 0x4ab   :  { %v1277_v16 = vpop.eup %1276  ;;  %1192 = vmatprep.subr.bf16.mxu0 %v1191_v13 }
 0x4ac   :  { %v309_v19 = vmul.f32 %v1277_v16, %v1273_v3  ;;  %v60_v16 = vld [vmem:[%s1538_s3] sm:$0xff] }
 0x4ad   :  { %v1209_v18 = vpack.c.bf16 %v61_v17, %v60_v16 }
 0x4ae   :  { %1112 = vmatprep.mubr.msk.f32.mxu0 %vm205_vm1, %v309_v19  ;;  %v62_v19 = vld [vmem:[%s1538_s3 + $0x10] sm:$0xff] }
 0x4af   :  { %1113 = vmatmul.mubr.msk.f32.vlgmr.msra.gmra.mrb[2].mxu0 %vm205_vm1, %v310_v20  ;;  %v63_v20 = vld [vmem:[%s1538_s3 + $0x18] sm:$0xff] }
 0x4b0   :  { %1194 = vmatpush3.bf16.msra.mxu0 %v1191_v13 }
 0x4b1   :  { %1197 = vmatprep.subr.msk.bf16.mxu0 %vm1406_vm2, %v1195_v21 }
 0x582   :  { %v1114_v22 = vpop.f32.mrb[2].mxu0 }
 0x583   :  { %v389_v23 = vpop.f32.mrb[3].mxu0 }
 0x584   :  { %1119 = vmatprep.mubr.msk.f32.mxu0 %vm205_vm1, %v389_v23 }
 0x585   :  { %1120 = vmatmul.mubr.msk.f32.vlgmr.msra.gmra.mrb[4].mxu0 %vm205_vm1, %v1114_v22 }
 0x586   :  { %1200 = vmatpush3.bf16.xpose.msk.msra.mxu0 %vm1406_vm2, %v1195_v21  ;;  %1126 = vmatprep.mubr.msk.f32.mxu0 %vm205_vm1, %v486_v24  ;;  %v1213_v21 = vpack.c.bf16 %v63_v20, %v62_v19 }
 0x587   :  { %1210 = vmatprep.subr.bf16.mxu0 %v1209_v18 }
 0x58d   :  { %1127 = vmatmul.mubr.msk.f32.vlgmr.msra.gmra.mrb[6].mxu0 %vm205_vm1, %v488_v25 }
 0x58e   :  { %1212 = vmatpush3.bf16.msra.mxu0 %v1209_v18 }
 0x58f   :  { %1214 = vmatprep.subr.bf16.mxu0 %v1213_v21 }
 0x592   :  { %1216 = vmatpush3.bf16.msra.mxu0 %v1213_v21 }
 0x658   :  { %v1121_v26 = vpop.f32.mrb[4].mxu0 }
 0x659   :  { %v470_v27 = vpop.f32.mrb[5].mxu0  ;;  %v484_v60 = vadd.f32 %v1121_v26, %v1027_v59 }
 0x65a   :  { %v483_v61 = vadd.f32 %v1027_v59, %v470_v27 }
 0x660   :  { %v1128_v28 = vpop.f32.mrb[6].mxu0 }
 0x661   :  { %v573_v29 = vadd.f32 %v1128_v28, %v50_v51  ;;  %v567_v30 = vpop.f32.mrb[7].mxu0 }
 0x662   :  { %v568_v31 = vadd.f32 %v567_v30, %v1415_v49  ;;  %v67_v49 = vld [vmem:[%s1539_s4 + $0x18] sm:$0xff] }
 0x663   :  { %v579_v32 = vsel %vm205_vm1, %v573_v29, -inf  ;;  %v1205_v50 = vpack.c.bf16 %v67_v49, %v66_v48  ;;  %v75_v48 = vld [vmem:[%s1539_s4 + $0x58] sm:$0xff] }
 0x664   :  { %580 = vmax.xlane.f32.xlu0 %v579_v32  ;;  %v576_v33 = vsel %vm205_vm1, %v568_v31, -inf }
 0x665   :  { %577 = vmax.xlane.f32.xlu1 %v576_v33 }
 0x676   :  { %1262 = vrot.lane.b32.xlu1 %v1400_v38, %s1327_s15 }
 0x6f1   :  { %v581_v34 = vpop.xlane.xlu0 %580 }
 0x6f2   :  { %v583_v35 = vsub.f32 %v573_v29, %v581_v34  ;;  %v578_v36 = vpop.xlane.xlu1 %577  ;;  %v1036_v29 = vld [vmem:[%s1536_s1 + $0x2] ss:$0 sm:$0xff] }
 0x6f3   :  { %v582_v37 = vsub.f32 %v568_v31, %v578_v36  ;;  %v1037_v31 = vld [vmem:[%s1536_s1 + $0x3] ss:$0 sm:$0xff] }
 0x6f4   :  { %v586_v39 = vmul.f32 1.442695, %v583_v35 }
 0x6f5   :  { %v584_v40 = vmul.f32 1.442695, %v582_v37 }
 0x6f6   :  { %v1263_v41 = vpop.permute.xlu1 %1262 }
 0x6f7   :  { %1278 = vpow2.f32 %v584_v40  ;;  %v1265_v42 = vunpack.i.h.bf16 %v1263_v41  ;;  %v1264_v43 = vunpack.i.l.bf16 %v1263_v41  ;;  %v69_v40 = vld [vmem:[%s1539_s4 + $0x28] sm:$0xff]  ;;  %v70_v41 = vld [vmem:[%s1539_s4 + $0x30] sm:$0xff] }
 0x6f8   :  { %1280 = vpow2.f32 %v586_v39  ;;  %v68_v39 = vld [vmem:[%s1539_s4 + $0x20] sm:$0xff] }
 0x6f9   :  { %v1201_v44 = vpack.c.bf16 %v1265_v42, %v1264_v43  ;;  %v1217_v42 = vpack.c.bf16 %v69_v40, %v68_v39  ;;  %v71_v43 = vld [vmem:[%s1539_s4 + $0x38] sm:$0xff] }
 0x6fb   :  { %1202 = vmatprep.subr.bf16.mxu1 %v1201_v44 }
 0x6fc   :  { %1204 = vmatpush3.bf16.msra.mxu1 %v1201_v44  ;;  %v1221_v44 = vpack.c.bf16 %v71_v43, %v70_v41 }
 0x6fd   :  { %1206 = vmatprep.subr.bf16.mxu1 %v1205_v50 }
 0x701   :  { %v1279_v45 = vpop.eup %1278 }
 0x702   :  { %v588_v46 = vsel %vm205_vm1, %v1279_v45, 0.0  ;;  %v1281_v47 = vpop.eup %1280 }
 0x703   :  { %589 = vadd.xlane.f32.xlu0 %v588_v46  ;;  %v591_v38 = vsel %vm205_vm1, %v1281_v47, 0.0  ;;  %v73_v46 = vld [vmem:[%s1539_s4 + $0x48] sm:$0xff] }
 0x707   :  { %592 = vadd.xlane.f32.xlu0 %v591_v38  ;;  %v74_v38 = vld [vmem:[%s1539_s4 + $0x50] sm:$0xff] }
 0x708   :  { %v1229_v49 = vpack.c.bf16 %v75_v48, %v74_v38 }
 0x790   :  { %v590_v51 = vpop.xlane.xlu0 %589 }
 0x791   :  { %1282 = vrcp.f32 %v590_v51 }
 0x794   :  { %v593_v52 = vpop.xlane.xlu0 %592 }
 0x795   :  { %1284 = vrcp.f32 %v593_v52 }
 0x79b   :  { %v1283_v53 = vpop.eup %1282 }
 0x79c   :  { %v596_v54 = vmul.f32 %v1283_v53, %v1279_v45  ;;  %v72_v45 = vld [vmem:[%s1539_s4 + $0x40] sm:$0xff]  ;;  %s1328_s4 = smov [#allocation2]  }
 0x79e   :  { %1133 = vmatprep.mubr.msk.f32.mxu1 %vm205_vm1, %v596_v54 }
 0x79f   :  { %v1285_v55 = vpop.eup %1284 }
 0x7a0   :  { %v597_v56 = vmul.f32 %v1285_v55, %v1281_v47  ;;  %v1225_v47 = vpack.c.bf16 %v73_v46, %v72_v45 }
 0x7a2   :  { %1134 = vmatmul.mubr.msk.f32.vlgmr.msra.gmra.mrb[2].mxu1 %vm205_vm1, %v597_v56 }
 0x7a3   :  { %1208 = vmatpush3.bf16.msra.mxu1 %v1205_v50 }
 0x7a4   :  { %1218 = vmatprep.subr.bf16.mxu1 %v1217_v42 }
 0x875   :  { %v1135_v57 = vpop.f32.mrb[2].mxu1 }
 0x876   :  { %v676_v58 = vpop.f32.mrb[3].mxu1 }
 0x877   :  { %1140 = vmatprep.mubr.msk.f32.mxu1 %vm205_vm1, %v676_v58 }
 0x878   :  { %1141 = vmatmul.mubr.msk.f32.vlgmr.msra.gmra.mrb[4].mxu1 %vm205_vm1, %v1135_v57 }
 0x879   :  { %1220 = vmatpush3.bf16.msra.mxu1 %v1217_v42 }
 0x87a   :  { %1222 = vmatprep.subr.bf16.mxu1 %v1221_v44 }
 0x87d   :  { %1224 = vmatpush3.bf16.msra.mxu1 %v1221_v44 }
 0x87e   :  { %1226 = vmatprep.subr.bf16.mxu1 %v1225_v47 }
 0x881   :  { %1228 = vmatpush3.bf16.msra.mxu1 %v1225_v47 }
 0x882   :  { %1230 = vmatprep.subr.bf16.mxu1 %v1229_v49 }
 0x885   :  { %1232 = vmatpush3.bf16.msra.mxu1 %v1229_v49 }
 0x94b   :  { %v1142_v62 = vpop.f32.mrb[4].mxu1 }
 0x94c   :  { %v767_v63 = vadd.f32 %v1142_v62, %v484_v60  ;;  %v757_v2 = vpop.f32.mrb[5].mxu1 }
 0x94d   :  { %v766_v3 = vadd.f32 %v757_v2, %v483_v61 }
 0x94e   :  { %v1463_v5 = vadd.f32 %v767_v63, %v1369_v1 }
 0x94f   :  { %v1460_v4 = vadd.f32 %v766_v3, %v1364_v0 }
 0x950   :  { %v773_v7 = vsel %vm78_vm0, %v1463_v5, 0.0 }
 0x951   :  { %v770_v6 = vsel %vm78_vm0, %v1460_v4, 0.0 }
 0x952   :  { %771 = vadd.xlane.f32.xlu0 %v770_v6 }
 0x956   :  { %774 = vadd.xlane.f32.xlu0 %v773_v7 }
 0x9df   :  { %v772_v8 = vpop.xlane.xlu0 %771 }
 0x9e0   :  { %v776_v9 = vmul.f32 0.03125, %v772_v8 }
 0x9e2   :  { %v778_v10 = vsub.f32 %v1460_v4, %v776_v9 }
 0x9e3   :  { %v775_v11 = vpop.xlane.xlu0 %774 }
 0x9e4   :  { %v777_v12 = vmul.f32 0.03125, %v775_v11  ;;  %v780_v13 = vmul.f32 %v778_v10, %v778_v10 }
 0x9e6   :  { %v779_v0 = vsub.f32 %v1463_v5, %v777_v12  ;;  %v782_v1 = vsel %vm78_vm0, %v780_v13, 0.0 }
 0x9e7   :  { %783 = vadd.xlane.f32.xlu0 %v782_v1 }
 0x9e8   :  { %v781_v14 = vmul.f32 %v779_v0, %v779_v0 }
 0x9ea   :  { %v785_v15 = vsel %vm78_vm0, %v781_v14, 0.0 }
 0x9eb   :  { %786 = vadd.xlane.f32.xlu0 %v785_v15 }
 0xa74   :  { %v784_v22 = vpop.xlane.xlu0 %783 }
 0xa75   :  { %v788_v23 = vmul.f32 0.03125, %v784_v22 }
 0xa77   :  { %v790_v24 = vadd.f32 1e-05, %v788_v23 }
 0xa78   :  { %v787_v25 = vpop.xlane.xlu0 %786 }
 0xa79   :  { %1286 = vrsqrt.f32 %v790_v24  ;;  %v789_v26 = vmul.f32 0.03125, %v787_v25 }
 0xa7b   :  { %v791_v27 = vadd.f32 1e-05, %v789_v26 }
 0xa7d   :  { %1288 = vrsqrt.f32 %v791_v27 }
 0xa83   :  { %v1287_v28 = vpop.eup %1286 }
 0xa84   :  { %v794_v30 = vmul.f32 %v1287_v28, %v778_v10 }
 0xa86   :  { %v800_v32 = vmul.f32 %v1036_v29, %v794_v30 }
 0xa87   :  { %v1289_v33 = vpop.eup %1288 }
 0xa88   :  { %v795_v34 = vmul.f32 %v1289_v33, %v779_v0  ;;  %v806_v35 = vadd.f32 %v1037_v31, %v800_v32 }
 0xa8a   :  { %v801_v36 = vmul.f32 %v1036_v29, %v795_v34  ;;  %1151 = vmatprep.mubr.msk.f32.mxu0 %vm78_vm0, %v806_v35 }
 0xa8c   :  { %v807_v37 = vadd.f32 %v1037_v31, %v801_v36 }
 0xa8e   :  { %1152 = vmatmul.mubr.msk.f32.vlgmr.msra.gmra.mrb[8].mxu0 %vm78_vm0, %v807_v37 }
 0xb61   :  { %v1153_v50 = vpop.f32.mrb[8].mxu0 }
 0xb62   :  { %907 = vrot.lane.b32.xlu0 %v1153_v50, %s1326_s10  ;;  %v880_v51 = vpop.f32.mrb[9].mxu0  ;;  %v1041_v53 = vmul.f32 -1.442695, %v1153_v50 }
 0xb63   :  { %905 = vrot.lane.b32.xlu1 %v880_v51, %s1326_s10  ;;  %v1040_v52 = vmul.f32 -1.442695, %v880_v51  ;;  %s1004_s10 = sshll.u32 %s1328_s4, 4  ;;  %s1005_s10 = int_to_ptr.vmem [resolvable:$true] %s1004_s10 }
 0xb64   :  { %s1298_s0 = scalar_lea.vmem %s1005_s10, 256  ;;  %p1303_p1 = scmp.lt.s32.totalorder %s1005_s10, %s1005_s10 }
 0xb65   :  { %1290 = vpow2.f32 %v1040_v52  ;;  %p1299_p0 = scmp.ne.s32.totalorder %s1005_s10, %s1298_s0  ;;  %p1304_p2 = scmp.lt.s32.totalorder %s1298_s0, %s1298_s0 }
 0xb66   :  { %1292 = vpow2.f32 %v1041_v53 }
 0xb67   :  { %p1305_p3 = por %p1304_p2, %p1303_p1 }
 0xb69   :  { %p1306_p4 = pnand %p1305_p3, %p1299_p0 }
 0xb6f   :  { %v1291_v54 = vpop.eup %1290 }
 0xb70   :  { %v1293_v55 = vpop.eup %1292  ;;  %v895_v56 = vadd.f32 1.0, %v1291_v54 }
 0xb71   :  { %v896_v57 = vadd.f32 1.0, %v1293_v55 }
 0xb72   :  { %1294 = vrcp.f32 %v895_v56 }
 0xb73   :  { %1296 = vrcp.f32 %v896_v57 }
 0xb7c   :  { %v1295_v58 = vpop.eup %1294 }
 0xb7d   :  { %v1297_v59 = vpop.eup %1296  ;;  %v901_v60 = vmul.f32 %v1295_v58, %v880_v51 }
 0xb7e   :  { %v902_v62 = vmul.f32 %v1297_v59, %v1153_v50 }
 0xbd4   :  { %v908_v61 = vpop.permute.xlu0 %907 }
 0xbd5   :  { %v906_v63 = vpop.permute.xlu1 %905  ;;  %v912_v3 = vmul.f32 %v908_v61, %v902_v62 }
 0xbd6   :  { %v911_v2 = vmul.f32 %v906_v63, %v901_v60 }
 0xbd8   :  { %1170 = vmatprep.mubr.msk.f32.mxu1 %vm913_vm11, %v911_v2 }
 0xbd9   :  { %1171 = vmatmul.mubr.msk.f32.vlgmr.msra.gmra.mrb[6].mxu1 %vm913_vm11, %v912_v3 }
 0xcac   :  { %v1172_v6 = vpop.f32.mrb[6].mxu1 }
 0xcad   :  { %v996_v7 = vadd.f32 %v1172_v6, %v1463_v5  ;;  %v986_v8 = vpop.f32.mrb[7].mxu1 }
 0xcae   :  { %v995_v9 = vadd.f32 %v986_v8, %v1460_v4 }
 0xcaf   :  { %998 = vst.msk [vmem:[#allocation2 + $0x8] sm:$0xff] %vm78_vm0, %v996_v7 }
 0xcb0   :  { %997 = vst.msk [vmem:[#allocation2] sm:$0xff] %vm78_vm0, %v995_v9 }
 0xcb1   :  { %1309 = shalt.err (!%p1306_p4)
}
 0xcb2   :  { %s1310_s24 = scalar_lea.hbm %s1540_s5, 256 }
 0xcb3   :  { %p1311_p5 = scmp.ne.s32.totalorder %s1540_s5, %s1310_s24  ;;  %p1314_p6 = scmp.lt.u32.totalorder %s1310_s24, %s1540_s5 }
 0xcb5   :  { %p1316_p7 = pnand %p1314_p6, %p1311_p5 }
 0xcb7   :  { %1319 = shalt.err (!%p1316_p7)
}
 0xcb8   :  { %s1329_s29 = smov 128   ;;  %s1330_s30 = smov 8  }
 0xcb9   :  { %1010 = dma.vmem_to_hbm [thread:$0]  %s1005_s10, 256, %s1540_s5, [#allocation3], %s1329_s29, %s1329_s29, %s1330_s30  }
 0xcba   :  { %1320 = dma.done.wait [#allocation3], 256  }
 0xcbb   :  { %1321 = vsyncadd [#allocation3], 4294967040 }
 0xcbc   :  { %1014 = vsyncpa [#allocation3], 1 }

</bundles_post_ra>
